<compile_context>
chip_gen: v5e
topology: v5e:2x2
jax: 0.10.0
libtpu: 0.0.40
codegen_flags: <defaults>
</compile_context>

<pallas_src>
import functools

import jax
import jax.numpy as jnp
from jax import lax
from jax.experimental import pallas as pl
from jax.experimental.pallas import tpu as pltpu


def _bert_embedding_kernel(
    # scalar-prefetch refs (SMEM), flattened token ids of length Np
    ids_ref,          # (Np,) int32  vocab ids
    pos_ids_ref,      # (Np,) int32  position ids
    tok_ids_ref,      # (Np,) int32  token-type ids
    # inputs
    vocab_hbm,        # (V, H)   in HBM (memory_space=pl.ANY), DMA-gathered
    pos_tab_ref,      # (P, H)   VMEM-resident
    tok_tab_ref,      # (T, H)   VMEM-resident
    gamma_ref,        # (1, H)
    beta_ref,         # (1, H)
    # output
    o_ref,            # (TT, H)
    # scratch
    vbuf,             # (TT, H)  gathered vocab rows (table dtype)
    acc_ref,          # (TT, H)  f32 accumulator for pos + token-type rows
    sem,              # (1,)     shared DMA completion semaphore
    *,
    token_tile: int,
    eps: float,
):
    TT = token_tile
    base = pl.program_id(0) * TT
    unroll = TT <= 16

    # 1) Issue one async row-gather DMA per token from the HBM-resident vocab
    #    table.  All copies signal the same semaphore.
    @pl.loop(0, TT, unroll=unroll)
    def _issue(i):
        row = ids_ref[base + i]
        pltpu.make_async_copy(
            vocab_hbm.at[pl.ds(row, 1), :], vbuf.at[pl.ds(i, 1), :], sem.at[0]
        ).start()

    # 2) While those DMAs are in flight, gather position / token-type rows
    #    from the small VMEM-resident tables and accumulate in f32.
    @pl.loop(0, TT, unroll=unroll)
    def _accum(i):
        p_row = pos_tab_ref[pl.ds(pos_ids_ref[base + i], 1), :]
        t_row = tok_tab_ref[pl.ds(tok_ids_ref[base + i], 1), :]
        acc_ref[pl.ds(i, 1), :] = (
            p_row.astype(jnp.float32) + t_row.astype(jnp.float32)
        )

    # 3) Wait for all vocab-row DMAs (same-shape dummy descriptor per copy,
    #    all sharing the single semaphore).
    @pl.loop(0, TT, unroll=unroll)
    def _wait(i):
        pltpu.make_async_copy(
            vocab_hbm.at[pl.ds(0, 1), :], vbuf.at[pl.ds(i, 1), :], sem.at[0]
        ).wait()

    # 4) Sum + LayerNorm (stats in f32), single lane-dense (TT, H) store.
    x = acc_ref[...] + vbuf[...].astype(jnp.float32)
    mu = jnp.mean(x, axis=-1, keepdims=True)
    var = jnp.mean((x - mu) ** 2, axis=-1, keepdims=True)
    y = (x - mu) * lax.rsqrt(var + eps)
    y = y * gamma_ref[...].astype(jnp.float32) + beta_ref[...].astype(jnp.float32)
    o_ref[...] = y.astype(o_ref.dtype)


def bert_embedding(input_ids, position_ids, token_type_ids, params, *, token_tile=8):
    """input_ids / position_ids / token_type_ids: (B, S) int.  Returns (B, S, H)."""
    B, S = input_ids.shape
    vocab_t = params["vocab_emb"]
    pos_t = params["pos_emb"]
    tok_t = params["tok_emb"]
    H = vocab_t.shape[1]
    out_dtype = vocab_t.dtype

    N = B * S
    TT = token_tile
    Np = ((N + TT - 1) // TT) * TT  # pad token count up to a whole tile

    def flat_ids(ids):
        f = ids.reshape(-1).astype(jnp.int32)
        if Np != N:
            f = jnp.pad(f, (0, Np - N))  # pad with id 0 (valid row), sliced off below
        return f

    ids_f = flat_ids(input_ids)
    pos_f = flat_ids(position_ids)
    tok_f = flat_ids(token_type_ids)

    gamma = params["ln_gamma"].reshape(1, H)
    beta = params["ln_beta"].reshape(1, H)

    kernel = functools.partial(_bert_embedding_kernel, token_tile=TT, eps=1e-5)

    out = pl.pallas_call(
        kernel,
        out_shape=jax.ShapeDtypeStruct((Np, H), out_dtype),
        grid_spec=pltpu.PrefetchScalarGridSpec(
            num_scalar_prefetch=3,
            grid=(Np // TT,),
            in_specs=[
                # vocab table: stays in HBM, gathered manually (too big for VMEM
                # at real BERT sizes, esp. on v7x's 64 MiB VMEM).
                pl.BlockSpec(memory_space=pl.ANY),
                # small tables + LN affine params: VMEM-resident, constant index_map.
                pl.BlockSpec(pos_t.shape, lambda t, *_: (0, 0)),
                pl.BlockSpec(tok_t.shape, lambda t, *_: (0, 0)),
                pl.BlockSpec((1, H), lambda t, *_: (0, 0)),
                pl.BlockSpec((1, H), lambda t, *_: (0, 0)),
            ],
            out_specs=pl.BlockSpec((TT, H), lambda t, *_: (t, 0)),
            scratch_shapes=[
                pltpu.VMEM((TT, H), vocab_t.dtype),   # gathered vocab rows
                pltpu.VMEM((TT, H), jnp.float32),     # pos + token-type accumulator
                pltpu.SemaphoreType.DMA((1,)),        # shared DMA semaphore
            ],
        ),
        compiler_params=pltpu.CompilerParams(
            dimension_semantics=("parallel",),
            vmem_limit_bytes=32 * 1024 * 1024,
        ),
    )(ids_f, pos_f, tok_f, vocab_t, pos_t, tok_t, gamma, beta)

    return out[:N].reshape(B, S, H)


def _reference(input_ids, position_ids, token_type_ids, params):
    """Pure-JAX reference for correctness check."""
    x = params["vocab_emb"][input_ids]
    x = x + params["pos_emb"][position_ids]
    x = x + params["tok_emb"][token_type_ids]
    mu = jnp.mean(x, axis=-1, keepdims=True)
    var = jnp.mean((x - mu) ** 2, axis=-1, keepdims=True)
    return (x - mu) * lax.rsqrt(var + 1e-5) * params["ln_gamma"] + params["ln_beta"]


if __name__ == "__main__":
    B, S, H = 2, 8, 32
    VOCAB, MAX_POS, TYPE_VOCAB = 128, 16, 2

    key = jax.random.PRNGKey(0)
    k = jax.random.split(key, 6)
    params = {
        "vocab_emb": 0.02 * jax.random.normal(k[0], (VOCAB, H), jnp.float32),
        "pos_emb":   0.02 * jax.random.normal(k[1], (MAX_POS, H), jnp.float32),
        "tok_emb":   0.02 * jax.random.normal(k[2], (TYPE_VOCAB, H), jnp.float32),
        "ln_gamma":  1.0 + 0.1 * jax.random.normal(k[3], (H,), jnp.float32),
        "ln_beta":   0.1 * jax.random.normal(k[4], (H,), jnp.float32),
    }

    input_ids = jax.random.randint(k[5], (B, S), 0, VOCAB, dtype=jnp.int32)
    position_ids = jnp.broadcast_to(jnp.arange(S, dtype=jnp.int32), (B, S))
    token_type_ids = jnp.concatenate(
        [jnp.zeros((B, S // 2), jnp.int32), jnp.ones((B, S - S // 2), jnp.int32)],
        axis=1,
    )

    out = bert_embedding(input_ids, position_ids, token_type_ids, params, token_tile=8)
    out = jax.block_until_ready(out)

    ref = _reference(input_ids, position_ids, token_type_ids, params)
    assert out.shape == (B, S, H)
    assert jnp.allclose(out, ref, atol=1e-4, rtol=1e-4), "mismatch vs pure-JAX reference"

    print("KERNEL_OK")
</pallas_src>

<mosaic_0001>
module attributes {stable_mosaic.version = 11 : i64} {
  func.func @_bert_embedding_kernel(%arg0: i32, %arg1: memref<16xi32, #tpu.memory_space<smem>>, %arg2: memref<16xi32, #tpu.memory_space<smem>>, %arg3: memref<16xi32, #tpu.memory_space<smem>>, %arg4: memref<128x32xf32, #tpu.memory_space<any>>, %arg5: memref<16x32xf32, #tpu.memory_space<vmem>>, %arg6: memref<2x32xf32, #tpu.memory_space<vmem>>, %arg7: memref<1x32xf32, #tpu.memory_space<vmem>>, %arg8: memref<1x32xf32, #tpu.memory_space<vmem>>, %arg9: memref<8x32xf32, #tpu.memory_space<vmem>>, %arg10: memref<8x32xf32, #tpu.memory_space<vmem>>, %arg11: memref<8x32xf32, #tpu.memory_space<vmem>>, %arg12: memref<1x!tpu.dma_semaphore, #tpu.memory_space<semaphore_mem>>) attributes {dimension_semantics = [#tpu.dimension_semantics<parallel>], iteration_bounds = array<i64: 2>, scalar_prefetch = 3 : i64, scratch_operands = 3 : i64, tpu.core_type = #tpu.core_type<tc>, window_params = [{}, {pipeline_mode = #tpu.pipeline_mode<synchronous>, transform_indices = @transform_1, window_bounds = array<i64: 16, 32>}, {pipeline_mode = #tpu.pipeline_mode<synchronous>, transform_indices = @transform_2, window_bounds = array<i64: 2, 32>}, {pipeline_mode = #tpu.pipeline_mode<synchronous>, transform_indices = @transform_3, window_bounds = array<i64: 1, 32>}, {pipeline_mode = #tpu.pipeline_mode<synchronous>, transform_indices = @transform_4, window_bounds = array<i64: 1, 32>}, {transform_indices = @transform_5, window_bounds = array<i64: 8, 32>}]} {
    %c8_i32 = arith.constant 8 : i32
    %0 = arith.muli %arg0, %c8_i32 : i32
    %c0_i32 = arith.constant 0 : i32
    %c1_i32 = arith.constant 1 : i32
    %1 = arith.muli %c0_i32, %c1_i32 : i32
    %c0_i32_0 = arith.constant 0 : i32
    %2 = arith.addi %c0_i32_0, %1 : i32
    %3 = arith.addi %0, %2 : i32
    %4 = arith.index_cast %3 : i32 to index
    %5 = memref.load %arg1[%4] : memref<16xi32, #tpu.memory_space<smem>>
    %c0_i32_1 = arith.constant 0 : i32
    %c0_i32_2 = arith.constant 0 : i32
    %6 = tpu.memref_slice %arg4[%5, %c0_i32_2] : memref<128x32xf32, #tpu.memory_space<any>> -> memref<1x32xf32, #tpu.memory_space<any>>
    %c0_i32_3 = arith.constant 0 : i32
    %7 = tpu.memref_slice %arg10[%2, %c0_i32_3] : memref<8x32xf32, #tpu.memory_space<vmem>> -> memref<1x32xf32, #tpu.memory_space<vmem>>
    %8 = tpu.memref_slice %arg12[%c0_i32_1] : memref<1x!tpu.dma_semaphore, #tpu.memory_space<semaphore_mem>> -> memref<1x!tpu.dma_semaphore, #tpu.memory_space<semaphore_mem>>
    %9 = tpu.memref_squeeze %8 : memref<1x!tpu.dma_semaphore, #tpu.memory_space<semaphore_mem>> -> memref<!tpu.dma_semaphore, #tpu.memory_space<semaphore_mem>>
    tpu.enqueue_dma source(%6 : memref<1x32xf32, #tpu.memory_space<any>>) target(%7 : memref<1x32xf32, #tpu.memory_space<vmem>>) target_semaphore(%9 : memref<!tpu.dma_semaphore, #tpu.memory_space<semaphore_mem>>)
    %c1_i32_4 = arith.constant 1 : i32
    %c1_i32_5 = arith.constant 1 : i32
    %10 = arith.muli %c1_i32_4, %c1_i32_5 : i32
    %c0_i32_6 = arith.constant 0 : i32
    %11 = arith.addi %c0_i32_6, %10 : i32
    %12 = arith.addi %0, %11 : i32
    %13 = arith.index_cast %12 : i32 to index
    %14 = memref.load %arg1[%13] : memref<16xi32, #tpu.memory_space<smem>>
    %c0_i32_7 = arith.constant 0 : i32
    %c0_i32_8 = arith.constant 0 : i32
    %15 = tpu.memref_slice %arg4[%14, %c0_i32_8] : memref<128x32xf32, #tpu.memory_space<any>> -> memref<1x32xf32, #tpu.memory_space<any>>
    %c0_i32_9 = arith.constant 0 : i32
    %16 = tpu.memref_slice %arg10[%11, %c0_i32_9] : memref<8x32xf32, #tpu.memory_space<vmem>> -> memref<1x32xf32, #tpu.memory_space<vmem>>
    %17 = tpu.memref_slice %arg12[%c0_i32_7] : memref<1x!tpu.dma_semaphore, #tpu.memory_space<semaphore_mem>> -> memref<1x!tpu.dma_semaphore, #tpu.memory_space<semaphore_mem>>
    %18 = tpu.memref_squeeze %17 : memref<1x!tpu.dma_semaphore, #tpu.memory_space<semaphore_mem>> -> memref<!tpu.dma_semaphore, #tpu.memory_space<semaphore_mem>>
    tpu.enqueue_dma source(%15 : memref<1x32xf32, #tpu.memory_space<any>>) target(%16 : memref<1x32xf32, #tpu.memory_space<vmem>>) target_semaphore(%18 : memref<!tpu.dma_semaphore, #tpu.memory_space<semaphore_mem>>)
    %c2_i32 = arith.constant 2 : i32
    %c1_i32_10 = arith.constant 1 : i32
    %19 = arith.muli %c2_i32, %c1_i32_10 : i32
    %c0_i32_11 = arith.constant 0 : i32
    %20 = arith.addi %c0_i32_11, %19 : i32
    %21 = arith.addi %0, %20 : i32
    %22 = arith.index_cast %21 : i32 to index
    %23 = memref.load %arg1[%22] : memref<16xi32, #tpu.memory_space<smem>>
    %c0_i32_12 = arith.constant 0 : i32
    %c0_i32_13 = arith.constant 0 : i32
    %24 = tpu.memref_slice %arg4[%23, %c0_i32_13] : memref<128x32xf32, #tpu.memory_space<any>> -> memref<1x32xf32, #tpu.memory_space<any>>
    %c0_i32_14 = arith.constant 0 : i32
    %25 = tpu.memref_slice %arg10[%20, %c0_i32_14] : memref<8x32xf32, #tpu.memory_space<vmem>> -> memref<1x32xf32, #tpu.memory_space<vmem>>
    %26 = tpu.memref_slice %arg12[%c0_i32_12] : memref<1x!tpu.dma_semaphore, #tpu.memory_space<semaphore_mem>> -> memref<1x!tpu.dma_semaphore, #tpu.memory_space<semaphore_mem>>
    %27 = tpu.memref_squeeze %26 : memref<1x!tpu.dma_semaphore, #tpu.memory_space<semaphore_mem>> -> memref<!tpu.dma_semaphore, #tpu.memory_space<semaphore_mem>>
    tpu.enqueue_dma source(%24 : memref<1x32xf32, #tpu.memory_space<any>>) target(%25 : memref<1x32xf32, #tpu.memory_space<vmem>>) target_semaphore(%27 : memref<!tpu.dma_semaphore, #tpu.memory_space<semaphore_mem>>)
    %c3_i32 = arith.constant 3 : i32
    %c1_i32_15 = arith.constant 1 : i32
    %28 = arith.muli %c3_i32, %c1_i32_15 : i32
    %c0_i32_16 = arith.constant 0 : i32
    %29 = arith.addi %c0_i32_16, %28 : i32
    %30 = arith.addi %0, %29 : i32
    %31 = arith.index_cast %30 : i32 to index
    %32 = memref.load %arg1[%31] : memref<16xi32, #tpu.memory_space<smem>>
    %c0_i32_17 = arith.constant 0 : i32
    %c0_i32_18 = arith.constant 0 : i32
    %33 = tpu.memref_slice %arg4[%32, %c0_i32_18] : memref<128x32xf32, #tpu.memory_space<any>> -> memref<1x32xf32, #tpu.memory_space<any>>
    %c0_i32_19 = arith.constant 0 : i32
    %34 = tpu.memref_slice %arg10[%29, %c0_i32_19] : memref<8x32xf32, #tpu.memory_space<vmem>> -> memref<1x32xf32, #tpu.memory_space<vmem>>
    %35 = tpu.memref_slice %arg12[%c0_i32_17] : memref<1x!tpu.dma_semaphore, #tpu.memory_space<semaphore_mem>> -> memref<1x!tpu.dma_semaphore, #tpu.memory_space<semaphore_mem>>
    %36 = tpu.memref_squeeze %35 : memref<1x!tpu.dma_semaphore, #tpu.memory_space<semaphore_mem>> -> memref<!tpu.dma_semaphore, #tpu.memory_space<semaphore_mem>>
    tpu.enqueue_dma source(%33 : memref<1x32xf32, #tpu.memory_space<any>>) target(%34 : memref<1x32xf32, #tpu.memory_space<vmem>>) target_semaphore(%36 : memref<!tpu.dma_semaphore, #tpu.memory_space<semaphore_mem>>)
    %c4_i32 = arith.constant 4 : i32
    %c1_i32_20 = arith.constant 1 : i32
    %37 = arith.muli %c4_i32, %c1_i32_20 : i32
    %c0_i32_21 = arith.constant 0 : i32
    %38 = arith.addi %c0_i32_21, %37 : i32
    %39 = arith.addi %0, %38 : i32
    %40 = arith.index_cast %39 : i32 to index
    %41 = memref.load %arg1[%40] : memref<16xi32, #tpu.memory_space<smem>>
    %c0_i32_22 = arith.constant 0 : i32
    %c0_i32_23 = arith.constant 0 : i32
    %42 = tpu.memref_slice %arg4[%41, %c0_i32_23] : memref<128x32xf32, #tpu.memory_space<any>> -> memref<1x32xf32, #tpu.memory_space<any>>
    %c0_i32_24 = arith.constant 0 : i32
    %43 = tpu.memref_slice %arg10[%38, %c0_i32_24] : memref<8x32xf32, #tpu.memory_space<vmem>> -> memref<1x32xf32, #tpu.memory_space<vmem>>
    %44 = tpu.memref_slice %arg12[%c0_i32_22] : memref<1x!tpu.dma_semaphore, #tpu.memory_space<semaphore_mem>> -> memref<1x!tpu.dma_semaphore, #tpu.memory_space<semaphore_mem>>
    %45 = tpu.memref_squeeze %44 : memref<1x!tpu.dma_semaphore, #tpu.memory_space<semaphore_mem>> -> memref<!tpu.dma_semaphore, #tpu.memory_space<semaphore_mem>>
    tpu.enqueue_dma source(%42 : memref<1x32xf32, #tpu.memory_space<any>>) target(%43 : memref<1x32xf32, #tpu.memory_space<vmem>>) target_semaphore(%45 : memref<!tpu.dma_semaphore, #tpu.memory_space<semaphore_mem>>)
    %c5_i32 = arith.constant 5 : i32
    %c1_i32_25 = arith.constant 1 : i32
    %46 = arith.muli %c5_i32, %c1_i32_25 : i32
    %c0_i32_26 = arith.constant 0 : i32
    %47 = arith.addi %c0_i32_26, %46 : i32
    %48 = arith.addi %0, %47 : i32
    %49 = arith.index_cast %48 : i32 to index
    %50 = memref.load %arg1[%49] : memref<16xi32, #tpu.memory_space<smem>>
    %c0_i32_27 = arith.constant 0 : i32
    %c0_i32_28 = arith.constant 0 : i32
    %51 = tpu.memref_slice %arg4[%50, %c0_i32_28] : memref<128x32xf32, #tpu.memory_space<any>> -> memref<1x32xf32, #tpu.memory_space<any>>
    %c0_i32_29 = arith.constant 0 : i32
    %52 = tpu.memref_slice %arg10[%47, %c0_i32_29] : memref<8x32xf32, #tpu.memory_space<vmem>> -> memref<1x32xf32, #tpu.memory_space<vmem>>
    %53 = tpu.memref_slice %arg12[%c0_i32_27] : memref<1x!tpu.dma_semaphore, #tpu.memory_space<semaphore_mem>> -> memref<1x!tpu.dma_semaphore, #tpu.memory_space<semaphore_mem>>
    %54 = tpu.memref_squeeze %53 : memref<1x!tpu.dma_semaphore, #tpu.memory_space<semaphore_mem>> -> memref<!tpu.dma_semaphore, #tpu.memory_space<semaphore_mem>>
    tpu.enqueue_dma source(%51 : memref<1x32xf32, #tpu.memory_space<any>>) target(%52 : memref<1x32xf32, #tpu.memory_space<vmem>>) target_semaphore(%54 : memref<!tpu.dma_semaphore, #tpu.memory_space<semaphore_mem>>)
    %c6_i32 = arith.constant 6 : i32
    %c1_i32_30 = arith.constant 1 : i32
    %55 = arith.muli %c6_i32, %c1_i32_30 : i32
    %c0_i32_31 = arith.constant 0 : i32
    %56 = arith.addi %c0_i32_31, %55 : i32
    %57 = arith.addi %0, %56 : i32
    %58 = arith.index_cast %57 : i32 to index
    %59 = memref.load %arg1[%58] : memref<16xi32, #tpu.memory_space<smem>>
    %c0_i32_32 = arith.constant 0 : i32
    %c0_i32_33 = arith.constant 0 : i32
    %60 = tpu.memref_slice %arg4[%59, %c0_i32_33] : memref<128x32xf32, #tpu.memory_space<any>> -> memref<1x32xf32, #tpu.memory_space<any>>
    %c0_i32_34 = arith.constant 0 : i32
    %61 = tpu.memref_slice %arg10[%56, %c0_i32_34] : memref<8x32xf32, #tpu.memory_space<vmem>> -> memref<1x32xf32, #tpu.memory_space<vmem>>
    %62 = tpu.memref_slice %arg12[%c0_i32_32] : memref<1x!tpu.dma_semaphore, #tpu.memory_space<semaphore_mem>> -> memref<1x!tpu.dma_semaphore, #tpu.memory_space<semaphore_mem>>
    %63 = tpu.memref_squeeze %62 : memref<1x!tpu.dma_semaphore, #tpu.memory_space<semaphore_mem>> -> memref<!tpu.dma_semaphore, #tpu.memory_space<semaphore_mem>>
    tpu.enqueue_dma source(%60 : memref<1x32xf32, #tpu.memory_space<any>>) target(%61 : memref<1x32xf32, #tpu.memory_space<vmem>>) target_semaphore(%63 : memref<!tpu.dma_semaphore, #tpu.memory_space<semaphore_mem>>)
    %c7_i32 = arith.constant 7 : i32
    %c1_i32_35 = arith.constant 1 : i32
    %64 = arith.muli %c7_i32, %c1_i32_35 : i32
    %c0_i32_36 = arith.constant 0 : i32
    %65 = arith.addi %c0_i32_36, %64 : i32
    %66 = arith.addi %0, %65 : i32
    %67 = arith.index_cast %66 : i32 to index
    %68 = memref.load %arg1[%67] : memref<16xi32, #tpu.memory_space<smem>>
    %c0_i32_37 = arith.constant 0 : i32
    %c0_i32_38 = arith.constant 0 : i32
    %69 = tpu.memref_slice %arg4[%68, %c0_i32_38] : memref<128x32xf32, #tpu.memory_space<any>> -> memref<1x32xf32, #tpu.memory_space<any>>
    %c0_i32_39 = arith.constant 0 : i32
    %70 = tpu.memref_slice %arg10[%65, %c0_i32_39] : memref<8x32xf32, #tpu.memory_space<vmem>> -> memref<1x32xf32, #tpu.memory_space<vmem>>
    %71 = tpu.memref_slice %arg12[%c0_i32_37] : memref<1x!tpu.dma_semaphore, #tpu.memory_space<semaphore_mem>> -> memref<1x!tpu.dma_semaphore, #tpu.memory_space<semaphore_mem>>
    %72 = tpu.memref_squeeze %71 : memref<1x!tpu.dma_semaphore, #tpu.memory_space<semaphore_mem>> -> memref<!tpu.dma_semaphore, #tpu.memory_space<semaphore_mem>>
    tpu.enqueue_dma source(%69 : memref<1x32xf32, #tpu.memory_space<any>>) target(%70 : memref<1x32xf32, #tpu.memory_space<vmem>>) target_semaphore(%72 : memref<!tpu.dma_semaphore, #tpu.memory_space<semaphore_mem>>)
    %c8_i32_40 = arith.constant 8 : i32
    %c0_i32_41 = arith.constant 0 : i32
    %c1_i32_42 = arith.constant 1 : i32
    %73 = arith.muli %c0_i32_41, %c1_i32_42 : i32
    %c0_i32_43 = arith.constant 0 : i32
    %74 = arith.addi %c0_i32_43, %73 : i32
    %75 = arith.addi %0, %74 : i32
    %76 = arith.index_cast %75 : i32 to index
    %77 = memref.load %arg2[%76] : memref<16xi32, #tpu.memory_space<smem>>
    %78 = arith.index_cast %77 : i32 to index
    %c0 = arith.constant 0 : index
    %79 = vector.load %arg5[%78, %c0] : memref<16x32xf32, #tpu.memory_space<vmem>>, vector<1x32xf32>
    %80 = arith.addi %0, %74 : i32
    %81 = arith.index_cast %80 : i32 to index
    %82 = memref.load %arg3[%81] : memref<16xi32, #tpu.memory_space<smem>>
    %83 = arith.index_cast %82 : i32 to index
    %c0_44 = arith.constant 0 : index
    %84 = vector.load %arg6[%83, %c0_44] : memref<2x32xf32, #tpu.memory_space<vmem>>, vector<1x32xf32>
    %85 = arith.addf %79, %84 : vector<1x32xf32>
    %86 = arith.index_cast %74 : i32 to index
    %c0_45 = arith.constant 0 : index
    %87 = vector.load %arg11[%86, %c0_45] : memref<8x32xf32, #tpu.memory_space<vmem>>, vector<1x32xf32>
    tpu.vector_store %arg11[%86, %c0_45], %85 {strides = array<i32>} : memref<8x32xf32, #tpu.memory_space<vmem>>, vector<1x32xf32>,
    %c1_i32_46 = arith.constant 1 : i32
    %c1_i32_47 = arith.constant 1 : i32
    %88 = arith.muli %c1_i32_46, %c1_i32_47 : i32
    %c0_i32_48 = arith.constant 0 : i32
    %89 = arith.addi %c0_i32_48, %88 : i32
    %90 = arith.addi %0, %89 : i32
    %91 = arith.index_cast %90 : i32 to index
    %92 = memref.load %arg2[%91] : memref<16xi32, #tpu.memory_space<smem>>
    %93 = arith.index_cast %92 : i32 to index
    %c0_49 = arith.constant 0 : index
    %94 = vector.load %arg5[%93, %c0_49] : memref<16x32xf32, #tpu.memory_space<vmem>>, vector<1x32xf32>
    %95 = arith.addi %0, %89 : i32
    %96 = arith.index_cast %95 : i32 to index
    %97 = memref.load %arg3[%96] : memref<16xi32, #tpu.memory_space<smem>>
    %98 = arith.index_cast %97 : i32 to index
    %c0_50 = arith.constant 0 : index
    %99 = vector.load %arg6[%98, %c0_50] : memref<2x32xf32, #tpu.memory_space<vmem>>, vector<1x32xf32>
    %100 = arith.addf %94, %99 : vector<1x32xf32>
    %101 = arith.index_cast %89 : i32 to index
    %c0_51 = arith.constant 0 : index
    %102 = vector.load %arg11[%101, %c0_51] : memref<8x32xf32, #tpu.memory_space<vmem>>, vector<1x32xf32>
    tpu.vector_store %arg11[%101, %c0_51], %100 {strides = array<i32>} : memref<8x32xf32, #tpu.memory_space<vmem>>, vector<1x32xf32>,
    %c2_i32_52 = arith.constant 2 : i32
    %c1_i32_53 = arith.constant 1 : i32
    %103 = arith.muli %c2_i32_52, %c1_i32_53 : i32
    %c0_i32_54 = arith.constant 0 : i32
    %104 = arith.addi %c0_i32_54, %103 : i32
    %105 = arith.addi %0, %104 : i32
    %106 = arith.index_cast %105 : i32 to index
    %107 = memref.load %arg2[%106] : memref<16xi32, #tpu.memory_space<smem>>
    %108 = arith.index_cast %107 : i32 to index
    %c0_55 = arith.constant 0 : index
    %109 = vector.load %arg5[%108, %c0_55] : memref<16x32xf32, #tpu.memory_space<vmem>>, vector<1x32xf32>
    %110 = arith.addi %0, %104 : i32
    %111 = arith.index_cast %110 : i32 to index
    %112 = memref.load %arg3[%111] : memref<16xi32, #tpu.memory_space<smem>>
    %113 = arith.index_cast %112 : i32 to index
    %c0_56 = arith.constant 0 : index
    %114 = vector.load %arg6[%113, %c0_56] : memref<2x32xf32, #tpu.memory_space<vmem>>, vector<1x32xf32>
    %115 = arith.addf %109, %114 : vector<1x32xf32>
    %116 = arith.index_cast %104 : i32 to index
    %c0_57 = arith.constant 0 : index
    %117 = vector.load %arg11[%116, %c0_57] : memref<8x32xf32, #tpu.memory_space<vmem>>, vector<1x32xf32>
    tpu.vector_store %arg11[%116, %c0_57], %115 {strides = array<i32>} : memref<8x32xf32, #tpu.memory_space<vmem>>, vector<1x32xf32>,
    %c3_i32_58 = arith.constant 3 : i32
    %c1_i32_59 = arith.constant 1 : i32
    %118 = arith.muli %c3_i32_58, %c1_i32_59 : i32
    %c0_i32_60 = arith.constant 0 : i32
    %119 = arith.addi %c0_i32_60, %118 : i32
    %120 = arith.addi %0, %119 : i32
    %121 = arith.index_cast %120 : i32 to index
    %122 = memref.load %arg2[%121] : memref<16xi32, #tpu.memory_space<smem>>
    %123 = arith.index_cast %122 : i32 to index
    %c0_61 = arith.constant 0 : index
    %124 = vector.load %arg5[%123, %c0_61] : memref<16x32xf32, #tpu.memory_space<vmem>>, vector<1x32xf32>
    %125 = arith.addi %0, %119 : i32
    %126 = arith.index_cast %125 : i32 to index
    %127 = memref.load %arg3[%126] : memref<16xi32, #tpu.memory_space<smem>>
    %128 = arith.index_cast %127 : i32 to index
    %c0_62 = arith.constant 0 : index
    %129 = vector.load %arg6[%128, %c0_62] : memref<2x32xf32, #tpu.memory_space<vmem>>, vector<1x32xf32>
    %130 = arith.addf %124, %129 : vector<1x32xf32>
    %131 = arith.index_cast %119 : i32 to index
    %c0_63 = arith.constant 0 : index
    %132 = vector.load %arg11[%131, %c0_63] : memref<8x32xf32, #tpu.memory_space<vmem>>, vector<1x32xf32>
    tpu.vector_store %arg11[%131, %c0_63], %130 {strides = array<i32>} : memref<8x32xf32, #tpu.memory_space<vmem>>, vector<1x32xf32>,
    %c4_i32_64 = arith.constant 4 : i32
    %c1_i32_65 = arith.constant 1 : i32
    %133 = arith.muli %c4_i32_64, %c1_i32_65 : i32
    %c0_i32_66 = arith.constant 0 : i32
    %134 = arith.addi %c0_i32_66, %133 : i32
    %135 = arith.addi %0, %134 : i32
    %136 = arith.index_cast %135 : i32 to index
    %137 = memref.load %arg2[%136] : memref<16xi32, #tpu.memory_space<smem>>
    %138 = arith.index_cast %137 : i32 to index
    %c0_67 = arith.constant 0 : index
    %139 = vector.load %arg5[%138, %c0_67] : memref<16x32xf32, #tpu.memory_space<vmem>>, vector<1x32xf32>
    %140 = arith.addi %0, %134 : i32
    %141 = arith.index_cast %140 : i32 to index
    %142 = memref.load %arg3[%141] : memref<16xi32, #tpu.memory_space<smem>>
    %143 = arith.index_cast %142 : i32 to index
    %c0_68 = arith.constant 0 : index
    %144 = vector.load %arg6[%143, %c0_68] : memref<2x32xf32, #tpu.memory_space<vmem>>, vector<1x32xf32>
    %145 = arith.addf %139, %144 : vector<1x32xf32>
    %146 = arith.index_cast %134 : i32 to index
    %c0_69 = arith.constant 0 : index
    %147 = vector.load %arg11[%146, %c0_69] : memref<8x32xf32, #tpu.memory_space<vmem>>, vector<1x32xf32>
    tpu.vector_store %arg11[%146, %c0_69], %145 {strides = array<i32>} : memref<8x32xf32, #tpu.memory_space<vmem>>, vector<1x32xf32>,
    %c5_i32_70 = arith.constant 5 : i32
    %c1_i32_71 = arith.constant 1 : i32
    %148 = arith.muli %c5_i32_70, %c1_i32_71 : i32
    %c0_i32_72 = arith.constant 0 : i32
    %149 = arith.addi %c0_i32_72, %148 : i32
    %150 = arith.addi %0, %149 : i32
    %151 = arith.index_cast %150 : i32 to index
    %152 = memref.load %arg2[%151] : memref<16xi32, #tpu.memory_space<smem>>
    %153 = arith.index_cast %152 : i32 to index
    %c0_73 = arith.constant 0 : index
    %154 = vector.load %arg5[%153, %c0_73] : memref<16x32xf32, #tpu.memory_space<vmem>>, vector<1x32xf32>
    %155 = arith.addi %0, %149 : i32
    %156 = arith.index_cast %155 : i32 to index
    %157 = memref.load %arg3[%156] : memref<16xi32, #tpu.memory_space<smem>>
    %158 = arith.index_cast %157 : i32 to index
    %c0_74 = arith.constant 0 : index
    %159 = vector.load %arg6[%158, %c0_74] : memref<2x32xf32, #tpu.memory_space<vmem>>, vector<1x32xf32>
    %160 = arith.addf %154, %159 : vector<1x32xf32>
    %161 = arith.index_cast %149 : i32 to index
    %c0_75 = arith.constant 0 : index
    %162 = vector.load %arg11[%161, %c0_75] : memref<8x32xf32, #tpu.memory_space<vmem>>, vector<1x32xf32>
    tpu.vector_store %arg11[%161, %c0_75], %160 {strides = array<i32>} : memref<8x32xf32, #tpu.memory_space<vmem>>, vector<1x32xf32>,
    %c6_i32_76 = arith.constant 6 : i32
    %c1_i32_77 = arith.constant 1 : i32
    %163 = arith.muli %c6_i32_76, %c1_i32_77 : i32
    %c0_i32_78 = arith.constant 0 : i32
    %164 = arith.addi %c0_i32_78, %163 : i32
    %165 = arith.addi %0, %164 : i32
    %166 = arith.index_cast %165 : i32 to index
    %167 = memref.load %arg2[%166] : memref<16xi32, #tpu.memory_space<smem>>
    %168 = arith.index_cast %167 : i32 to index
    %c0_79 = arith.constant 0 : index
    %169 = vector.load %arg5[%168, %c0_79] : memref<16x32xf32, #tpu.memory_space<vmem>>, vector<1x32xf32>
    %170 = arith.addi %0, %164 : i32
    %171 = arith.index_cast %170 : i32 to index
    %172 = memref.load %arg3[%171] : memref<16xi32, #tpu.memory_space<smem>>
    %173 = arith.index_cast %172 : i32 to index
    %c0_80 = arith.constant 0 : index
    %174 = vector.load %arg6[%173, %c0_80] : memref<2x32xf32, #tpu.memory_space<vmem>>, vector<1x32xf32>
    %175 = arith.addf %169, %174 : vector<1x32xf32>
    %176 = arith.index_cast %164 : i32 to index
    %c0_81 = arith.constant 0 : index
    %177 = vector.load %arg11[%176, %c0_81] : memref<8x32xf32, #tpu.memory_space<vmem>>, vector<1x32xf32>
    tpu.vector_store %arg11[%176, %c0_81], %175 {strides = array<i32>} : memref<8x32xf32, #tpu.memory_space<vmem>>, vector<1x32xf32>,
    %c7_i32_82 = arith.constant 7 : i32
    %c1_i32_83 = arith.constant 1 : i32
    %178 = arith.muli %c7_i32_82, %c1_i32_83 : i32
    %c0_i32_84 = arith.constant 0 : i32
    %179 = arith.addi %c0_i32_84, %178 : i32
    %180 = arith.addi %0, %179 : i32
    %181 = arith.index_cast %180 : i32 to index
    %182 = memref.load %arg2[%181] : memref<16xi32, #tpu.memory_space<smem>>
    %183 = arith.index_cast %182 : i32 to index
    %c0_85 = arith.constant 0 : index
    %184 = vector.load %arg5[%183, %c0_85] : memref<16x32xf32, #tpu.memory_space<vmem>>, vector<1x32xf32>
    %185 = arith.addi %0, %179 : i32
    %186 = arith.index_cast %185 : i32 to index
    %187 = memref.load %arg3[%186] : memref<16xi32, #tpu.memory_space<smem>>
    %188 = arith.index_cast %187 : i32 to index
    %c0_86 = arith.constant 0 : index
    %189 = vector.load %arg6[%188, %c0_86] : memref<2x32xf32, #tpu.memory_space<vmem>>, vector<1x32xf32>
    %190 = arith.addf %184, %189 : vector<1x32xf32>
    %191 = arith.index_cast %179 : i32 to index
    %c0_87 = arith.constant 0 : index
    %192 = vector.load %arg11[%191, %c0_87] : memref<8x32xf32, #tpu.memory_space<vmem>>, vector<1x32xf32>
    tpu.vector_store %arg11[%191, %c0_87], %190 {strides = array<i32>} : memref<8x32xf32, #tpu.memory_space<vmem>>, vector<1x32xf32>,
    %c8_i32_88 = arith.constant 8 : i32
    %c0_i32_89 = arith.constant 0 : i32
    %c1_i32_90 = arith.constant 1 : i32
    %193 = arith.muli %c0_i32_89, %c1_i32_90 : i32
    %c0_i32_91 = arith.constant 0 : i32
    %194 = arith.addi %c0_i32_91, %193 : i32
    %c0_i32_92 = arith.constant 0 : i32
    %c0_i32_93 = arith.constant 0 : i32
    %c0_i32_94 = arith.constant 0 : i32
    %195 = tpu.memref_slice %arg4[%c0_i32_93, %c0_i32_94] : memref<128x32xf32, #tpu.memory_space<any>> -> memref<1x32xf32, #tpu.memory_space<any>>
    %c0_i32_95 = arith.constant 0 : i32
    %196 = tpu.memref_slice %arg10[%194, %c0_i32_95] : memref<8x32xf32, #tpu.memory_space<vmem>> -> memref<1x32xf32, #tpu.memory_space<vmem>>
    %197 = tpu.memref_slice %arg12[%c0_i32_92] : memref<1x!tpu.dma_semaphore, #tpu.memory_space<semaphore_mem>> -> memref<1x!tpu.dma_semaphore, #tpu.memory_space<semaphore_mem>>
    %198 = tpu.memref_squeeze %197 : memref<1x!tpu.dma_semaphore, #tpu.memory_space<semaphore_mem>> -> memref<!tpu.dma_semaphore, #tpu.memory_space<semaphore_mem>>
    tpu.wait_dma2 semaphore(%198 : memref<!tpu.dma_semaphore, #tpu.memory_space<semaphore_mem>>) src(%195 : memref<1x32xf32, #tpu.memory_space<any>>) dst(%196 : memref<1x32xf32, #tpu.memory_space<vmem>>)
    %c1_i32_96 = arith.constant 1 : i32
    %c1_i32_97 = arith.constant 1 : i32
    %199 = arith.muli %c1_i32_96, %c1_i32_97 : i32
    %c0_i32_98 = arith.constant 0 : i32
    %200 = arith.addi %c0_i32_98, %199 : i32
    %c0_i32_99 = arith.constant 0 : i32
    %c0_i32_100 = arith.constant 0 : i32
    %c0_i32_101 = arith.constant 0 : i32
    %201 = tpu.memref_slice %arg4[%c0_i32_100, %c0_i32_101] : memref<128x32xf32, #tpu.memory_space<any>> -> memref<1x32xf32, #tpu.memory_space<any>>
    %c0_i32_102 = arith.constant 0 : i32
    %202 = tpu.memref_slice %arg10[%200, %c0_i32_102] : memref<8x32xf32, #tpu.memory_space<vmem>> -> memref<1x32xf32, #tpu.memory_space<vmem>>
    %203 = tpu.memref_slice %arg12[%c0_i32_99] : memref<1x!tpu.dma_semaphore, #tpu.memory_space<semaphore_mem>> -> memref<1x!tpu.dma_semaphore, #tpu.memory_space<semaphore_mem>>
    %204 = tpu.memref_squeeze %203 : memref<1x!tpu.dma_semaphore, #tpu.memory_space<semaphore_mem>> -> memref<!tpu.dma_semaphore, #tpu.memory_space<semaphore_mem>>
    tpu.wait_dma2 semaphore(%204 : memref<!tpu.dma_semaphore, #tpu.memory_space<semaphore_mem>>) src(%201 : memref<1x32xf32, #tpu.memory_space<any>>) dst(%202 : memref<1x32xf32, #tpu.memory_space<vmem>>)
    %c2_i32_103 = arith.constant 2 : i32
    %c1_i32_104 = arith.constant 1 : i32
    %205 = arith.muli %c2_i32_103, %c1_i32_104 : i32
    %c0_i32_105 = arith.constant 0 : i32
    %206 = arith.addi %c0_i32_105, %205 : i32
    %c0_i32_106 = arith.constant 0 : i32
    %c0_i32_107 = arith.constant 0 : i32
    %c0_i32_108 = arith.constant 0 : i32
    %207 = tpu.memref_slice %arg4[%c0_i32_107, %c0_i32_108] : memref<128x32xf32, #tpu.memory_space<any>> -> memref<1x32xf32, #tpu.memory_space<any>>
    %c0_i32_109 = arith.constant 0 : i32
    %208 = tpu.memref_slice %arg10[%206, %c0_i32_109] : memref<8x32xf32, #tpu.memory_space<vmem>> -> memref<1x32xf32, #tpu.memory_space<vmem>>
    %209 = tpu.memref_slice %arg12[%c0_i32_106] : memref<1x!tpu.dma_semaphore, #tpu.memory_space<semaphore_mem>> -> memref<1x!tpu.dma_semaphore, #tpu.memory_space<semaphore_mem>>
    %210 = tpu.memref_squeeze %209 : memref<1x!tpu.dma_semaphore, #tpu.memory_space<semaphore_mem>> -> memref<!tpu.dma_semaphore, #tpu.memory_space<semaphore_mem>>
    tpu.wait_dma2 semaphore(%210 : memref<!tpu.dma_semaphore, #tpu.memory_space<semaphore_mem>>) src(%207 : memref<1x32xf32, #tpu.memory_space<any>>) dst(%208 : memref<1x32xf32, #tpu.memory_space<vmem>>)
    %c3_i32_110 = arith.constant 3 : i32
    %c1_i32_111 = arith.constant 1 : i32
    %211 = arith.muli %c3_i32_110, %c1_i32_111 : i32
    %c0_i32_112 = arith.constant 0 : i32
    %212 = arith.addi %c0_i32_112, %211 : i32
    %c0_i32_113 = arith.constant 0 : i32
    %c0_i32_114 = arith.constant 0 : i32
    %c0_i32_115 = arith.constant 0 : i32
    %213 = tpu.memref_slice %arg4[%c0_i32_114, %c0_i32_115] : memref<128x32xf32, #tpu.memory_space<any>> -> memref<1x32xf32, #tpu.memory_space<any>>
    %c0_i32_116 = arith.constant 0 : i32
    %214 = tpu.memref_slice %arg10[%212, %c0_i32_116] : memref<8x32xf32, #tpu.memory_space<vmem>> -> memref<1x32xf32, #tpu.memory_space<vmem>>
    %215 = tpu.memref_slice %arg12[%c0_i32_113] : memref<1x!tpu.dma_semaphore, #tpu.memory_space<semaphore_mem>> -> memref<1x!tpu.dma_semaphore, #tpu.memory_space<semaphore_mem>>
    %216 = tpu.memref_squeeze %215 : memref<1x!tpu.dma_semaphore, #tpu.memory_space<semaphore_mem>> -> memref<!tpu.dma_semaphore, #tpu.memory_space<semaphore_mem>>
    tpu.wait_dma2 semaphore(%216 : memref<!tpu.dma_semaphore, #tpu.memory_space<semaphore_mem>>) src(%213 : memref<1x32xf32, #tpu.memory_space<any>>) dst(%214 : memref<1x32xf32, #tpu.memory_space<vmem>>)
    %c4_i32_117 = arith.constant 4 : i32
    %c1_i32_118 = arith.constant 1 : i32
    %217 = arith.muli %c4_i32_117, %c1_i32_118 : i32
    %c0_i32_119 = arith.constant 0 : i32
    %218 = arith.addi %c0_i32_119, %217 : i32
    %c0_i32_120 = arith.constant 0 : i32
    %c0_i32_121 = arith.constant 0 : i32
    %c0_i32_122 = arith.constant 0 : i32
    %219 = tpu.memref_slice %arg4[%c0_i32_121, %c0_i32_122] : memref<128x32xf32, #tpu.memory_space<any>> -> memref<1x32xf32, #tpu.memory_space<any>>
    %c0_i32_123 = arith.constant 0 : i32
    %220 = tpu.memref_slice %arg10[%218, %c0_i32_123] : memref<8x32xf32, #tpu.memory_space<vmem>> -> memref<1x32xf32, #tpu.memory_space<vmem>>
    %221 = tpu.memref_slice %arg12[%c0_i32_120] : memref<1x!tpu.dma_semaphore, #tpu.memory_space<semaphore_mem>> -> memref<1x!tpu.dma_semaphore, #tpu.memory_space<semaphore_mem>>
    %222 = tpu.memref_squeeze %221 : memref<1x!tpu.dma_semaphore, #tpu.memory_space<semaphore_mem>> -> memref<!tpu.dma_semaphore, #tpu.memory_space<semaphore_mem>>
    tpu.wait_dma2 semaphore(%222 : memref<!tpu.dma_semaphore, #tpu.memory_space<semaphore_mem>>) src(%219 : memref<1x32xf32, #tpu.memory_space<any>>) dst(%220 : memref<1x32xf32, #tpu.memory_space<vmem>>)
    %c5_i32_124 = arith.constant 5 : i32
    %c1_i32_125 = arith.constant 1 : i32
    %223 = arith.muli %c5_i32_124, %c1_i32_125 : i32
    %c0_i32_126 = arith.constant 0 : i32
    %224 = arith.addi %c0_i32_126, %223 : i32
    %c0_i32_127 = arith.constant 0 : i32
    %c0_i32_128 = arith.constant 0 : i32
    %c0_i32_129 = arith.constant 0 : i32
    %225 = tpu.memref_slice %arg4[%c0_i32_128, %c0_i32_129] : memref<128x32xf32, #tpu.memory_space<any>> -> memref<1x32xf32, #tpu.memory_space<any>>
    %c0_i32_130 = arith.constant 0 : i32
    %226 = tpu.memref_slice %arg10[%224, %c0_i32_130] : memref<8x32xf32, #tpu.memory_space<vmem>> -> memref<1x32xf32, #tpu.memory_space<vmem>>
    %227 = tpu.memref_slice %arg12[%c0_i32_127] : memref<1x!tpu.dma_semaphore, #tpu.memory_space<semaphore_mem>> -> memref<1x!tpu.dma_semaphore, #tpu.memory_space<semaphore_mem>>
    %228 = tpu.memref_squeeze %227 : memref<1x!tpu.dma_semaphore, #tpu.memory_space<semaphore_mem>> -> memref<!tpu.dma_semaphore, #tpu.memory_space<semaphore_mem>>
    tpu.wait_dma2 semaphore(%228 : memref<!tpu.dma_semaphore, #tpu.memory_space<semaphore_mem>>) src(%225 : memref<1x32xf32, #tpu.memory_space<any>>) dst(%226 : memref<1x32xf32, #tpu.memory_space<vmem>>)
    %c6_i32_131 = arith.constant 6 : i32
    %c1_i32_132 = arith.constant 1 : i32
    %229 = arith.muli %c6_i32_131, %c1_i32_132 : i32
    %c0_i32_133 = arith.constant 0 : i32
    %230 = arith.addi %c0_i32_133, %229 : i32
    %c0_i32_134 = arith.constant 0 : i32
    %c0_i32_135 = arith.constant 0 : i32
    %c0_i32_136 = arith.constant 0 : i32
    %231 = tpu.memref_slice %arg4[%c0_i32_135, %c0_i32_136] : memref<128x32xf32, #tpu.memory_space<any>> -> memref<1x32xf32, #tpu.memory_space<any>>
    %c0_i32_137 = arith.constant 0 : i32
    %232 = tpu.memref_slice %arg10[%230, %c0_i32_137] : memref<8x32xf32, #tpu.memory_space<vmem>> -> memref<1x32xf32, #tpu.memory_space<vmem>>
    %233 = tpu.memref_slice %arg12[%c0_i32_134] : memref<1x!tpu.dma_semaphore, #tpu.memory_space<semaphore_mem>> -> memref<1x!tpu.dma_semaphore, #tpu.memory_space<semaphore_mem>>
    %234 = tpu.memref_squeeze %233 : memref<1x!tpu.dma_semaphore, #tpu.memory_space<semaphore_mem>> -> memref<!tpu.dma_semaphore, #tpu.memory_space<semaphore_mem>>
    tpu.wait_dma2 semaphore(%234 : memref<!tpu.dma_semaphore, #tpu.memory_space<semaphore_mem>>) src(%231 : memref<1x32xf32, #tpu.memory_space<any>>) dst(%232 : memref<1x32xf32, #tpu.memory_space<vmem>>)
    %c7_i32_138 = arith.constant 7 : i32
    %c1_i32_139 = arith.constant 1 : i32
    %235 = arith.muli %c7_i32_138, %c1_i32_139 : i32
    %c0_i32_140 = arith.constant 0 : i32
    %236 = arith.addi %c0_i32_140, %235 : i32
    %c0_i32_141 = arith.constant 0 : i32
    %c0_i32_142 = arith.constant 0 : i32
    %c0_i32_143 = arith.constant 0 : i32
    %237 = tpu.memref_slice %arg4[%c0_i32_142, %c0_i32_143] : memref<128x32xf32, #tpu.memory_space<any>> -> memref<1x32xf32, #tpu.memory_space<any>>
    %c0_i32_144 = arith.constant 0 : i32
    %238 = tpu.memref_slice %arg10[%236, %c0_i32_144] : memref<8x32xf32, #tpu.memory_space<vmem>> -> memref<1x32xf32, #tpu.memory_space<vmem>>
    %239 = tpu.memref_slice %arg12[%c0_i32_141] : memref<1x!tpu.dma_semaphore, #tpu.memory_space<semaphore_mem>> -> memref<1x!tpu.dma_semaphore, #tpu.memory_space<semaphore_mem>>
    %240 = tpu.memref_squeeze %239 : memref<1x!tpu.dma_semaphore, #tpu.memory_space<semaphore_mem>> -> memref<!tpu.dma_semaphore, #tpu.memory_space<semaphore_mem>>
    tpu.wait_dma2 semaphore(%240 : memref<!tpu.dma_semaphore, #tpu.memory_space<semaphore_mem>>) src(%237 : memref<1x32xf32, #tpu.memory_space<any>>) dst(%238 : memref<1x32xf32, #tpu.memory_space<vmem>>)
    %c8_i32_145 = arith.constant 8 : i32
    %c0_146 = arith.constant 0 : index
    %c0_147 = arith.constant 0 : index
    %241 = vector.load %arg11[%c0_146, %c0_147] : memref<8x32xf32, #tpu.memory_space<vmem>>, vector<8x32xf32>
    %c0_148 = arith.constant 0 : index
    %c0_149 = arith.constant 0 : index
    %242 = vector.load %arg10[%c0_148, %c0_149] : memref<8x32xf32, #tpu.memory_space<vmem>>, vector<8x32xf32>
    %243 = arith.addf %241, %242 : vector<8x32xf32>
    %cst = arith.constant dense<0.000000e+00> : vector<8xf32>
    %244 = vector.multi_reduction <add>, %243, %cst [1] : vector<8x32xf32> to vector<8xf32>
    %245 = vector.shape_cast %244 : vector<8xf32> to vector<8x1xf32>
    %cst_150 = arith.constant 3.200000e+01 : f32
    %246 = vector.broadcast %cst_150 : f32 to vector<8x1xf32>
    %247 = arith.divf %245, %246 : vector<8x1xf32>
    %248 = vector.broadcast %247 : vector<8x1xf32> to vector<8x32xf32>
    %249 = arith.subf %243, %248 : vector<8x32xf32>
    %250 = arith.mulf %249, %249 : vector<8x32xf32>
    %cst_151 = arith.constant dense<0.000000e+00> : vector<8xf32>
    %251 = vector.multi_reduction <add>, %250, %cst_151 [1] : vector<8x32xf32> to vector<8xf32>
    %252 = vector.shape_cast %251 : vector<8xf32> to vector<8x1xf32>
    %cst_152 = arith.constant 3.200000e+01 : f32
    %253 = vector.broadcast %cst_152 : f32 to vector<8x1xf32>
    %254 = arith.divf %252, %253 : vector<8x1xf32>
    %255 = vector.broadcast %247 : vector<8x1xf32> to vector<8x32xf32>
    %256 = arith.subf %243, %255 : vector<8x32xf32>
    %cst_153 = arith.constant 9.99999974E-6 : f32
    %257 = vector.broadcast %cst_153 : f32 to vector<8x1xf32>
    %258 = arith.addf %254, %257 : vector<8x1xf32>
    %259 = math.rsqrt %258 : vector<8x1xf32>
    %260 = vector.broadcast %259 : vector<8x1xf32> to vector<8x32xf32>
    %261 = arith.mulf %256, %260 : vector<8x32xf32>
    %c0_154 = arith.constant 0 : index
    %c0_155 = arith.constant 0 : index
    %262 = vector.load %arg7[%c0_154, %c0_155] : memref<1x32xf32, #tpu.memory_space<vmem>>, vector<1x32xf32>
    %263 = vector.broadcast %262 : vector<1x32xf32> to vector<8x32xf32>
    %264 = arith.mulf %261, %263 : vector<8x32xf32>
    %c0_156 = arith.constant 0 : index
    %c0_157 = arith.constant 0 : index
    %265 = vector.load %arg8[%c0_156, %c0_157] : memref<1x32xf32, #tpu.memory_space<vmem>>, vector<1x32xf32>
    %266 = vector.broadcast %265 : vector<1x32xf32> to vector<8x32xf32>
    %267 = arith.addf %264, %266 : vector<8x32xf32>
    %c0_158 = arith.constant 0 : index
    %c0_159 = arith.constant 0 : index
    %268 = vector.load %arg9[%c0_158, %c0_159] : memref<8x32xf32, #tpu.memory_space<vmem>>, vector<8x32xf32>
    tpu.vector_store %arg9[%c0_158, %c0_159], %267 {strides = array<i32>} : memref<8x32xf32, #tpu.memory_space<vmem>>, vector<8x32xf32>,
    return
  }
  func.func @transform_1(%arg0: i32, %arg1: memref<16xi32, #tpu.memory_space<smem>>, %arg2: memref<16xi32, #tpu.memory_space<smem>>, %arg3: memref<16xi32, #tpu.memory_space<smem>>) -> (i32, i32) {
    %c0_i32 = arith.constant 0 : i32
    %c0_i32_0 = arith.constant 0 : i32
    %c0_i32_1 = arith.constant 0 : i32
    return %c0_i32, %c0_i32_0 : i32, i32
  }
  func.func @transform_2(%arg0: i32, %arg1: memref<16xi32, #tpu.memory_space<smem>>, %arg2: memref<16xi32, #tpu.memory_space<smem>>, %arg3: memref<16xi32, #tpu.memory_space<smem>>) -> (i32, i32) {
    %c0_i32 = arith.constant 0 : i32
    %c0_i32_0 = arith.constant 0 : i32
    %c0_i32_1 = arith.constant 0 : i32
    return %c0_i32, %c0_i32_0 : i32, i32
  }
  func.func @transform_3(%arg0: i32, %arg1: memref<16xi32, #tpu.memory_space<smem>>, %arg2: memref<16xi32, #tpu.memory_space<smem>>, %arg3: memref<16xi32, #tpu.memory_space<smem>>) -> (i32, i32) {
    %c0_i32 = arith.constant 0 : i32
    %c0_i32_0 = arith.constant 0 : i32
    %c0_i32_1 = arith.constant 0 : i32
    return %c0_i32, %c0_i32_0 : i32, i32
  }
  func.func @transform_4(%arg0: i32, %arg1: memref<16xi32, #tpu.memory_space<smem>>, %arg2: memref<16xi32, #tpu.memory_space<smem>>, %arg3: memref<16xi32, #tpu.memory_space<smem>>) -> (i32, i32) {
    %c0_i32 = arith.constant 0 : i32
    %c0_i32_0 = arith.constant 0 : i32
    %c0_i32_1 = arith.constant 0 : i32
    return %c0_i32, %c0_i32_0 : i32, i32
  }
  func.func @transform_5(%arg0: i32, %arg1: memref<16xi32, #tpu.memory_space<smem>>, %arg2: memref<16xi32, #tpu.memory_space<smem>>, %arg3: memref<16xi32, #tpu.memory_space<smem>>) -> (i32, i32) {
    %c0_i32 = arith.constant 0 : i32
    %c0_i32_0 = arith.constant 0 : i32
    return %arg0, %c0_i32 : i32, i32
  }
}

</mosaic_0001>

<bundles_post_ra>
// kernel: tpu_custom_call.1
= control target key start
LH: loop header
LB: loop body
LE: loop exit
PB: predicated region body
PF: predicated region fallthrough
CT: control target
= control target key end

     0   :  { %s915_s11 = smov [#allocation6]   ;;  %s916_s12 = smov [#allocation7]   ;;  %s1197_s0 = inlined_call_operand.vmem [shape: s32[16], index: 0, kind: input, shape index: {}]   ;;  %s1198_s3 = inlined_call_operand.vmem [shape: f32[128,32], index: 3, kind: input, shape index: {}]   ;;  %s1199_s4 = inlined_call_operand.vmem [shape: f32[16,32], index: 4, kind: input, shape index: {}]   ;;  %s1200_s5 = inlined_call_operand.vmem [shape: f32[2,32], index: 5, kind: input, shape index: {}]   ;;  %s1201_s6 = inlined_call_operand.vmem [shape: f32[1,32], index: 6, kind: input, shape index: {}]   ;;  %s1202_s7 = inlined_call_operand.vmem [shape: f32[1,32], index: 7, kind: input, shape index: {}]   ;;  %s1203_s8 = inlined_call_operand.hbm [shape: f32[16,32], index: 8, kind: output, shape index: {}]   ;;  %s1204_s1 = inlined_call_operand.vmem [shape: s32[16], index: 1, kind: input, shape index: {}]   ;;  %s1205_s2 = inlined_call_operand.vmem [shape: s32[16], index: 2, kind: input, shape index: {}]  }
   0x1   :  { %1213 = sst [smem:[#allocation28_spill]] %s1198_s3  ;;  %s14_s29 = sshll.u32 %s1197_s0, 4  ;;  %s15_s29 = int_to_ptr.vmem [resolvable:$true] %s14_s29 }
   0x2   :  { %1214 = sst [smem:[#allocation29_spill]] %s1202_s7  ;;  %s19_s10 = sshll.u32 %s1204_s1, 4  ;;  %s20_s10 = int_to_ptr.vmem [resolvable:$true] %s19_s10 }
   0x3   :  { %17 = dma.vmem_to_smem %s15_s29, 16, %s915_s11, [#allocation5] }
   0x4   :  { %22 = dma.vmem_to_smem %s20_s10, 16, %s916_s12, [#allocation5] }
   0x5   :  { %s24_s15 = sshll.u32 %s1205_s2, 4  ;;  %s917_s16 = smov [#allocation8]   ;;  %s25_s15 = int_to_ptr.vmem [resolvable:$true] %s24_s15 }
   0x6   :  { %27 = dma.vmem_to_smem %s25_s15, 16, %s917_s16, [#allocation5] }
   0x7   :  { %891 = dma.done.wait [#allocation5], 48 }
   0x8   :  { %892 = vsyncadd [#allocation5], 4294967248 }
   0x9   :  { %30 = sfence }
   0xa   :  { %31 = vsyncpa [#allocation10], 0 }
   0xb   :  { %33 = vsyncpa [#allocation10 + $0x1], 0  ;;  %s973_s0 = smov 0   ;;  %s975_s1 = smov 0  }
   0xc   :  { %s977_s17 = smov 0   ;;  %s979_s18 = smov 0  }
   0xd LB: > { %1215 = sst [smem:[#allocation22_spill]] %s901_s0  ;;  %s751_s2 = sadd.s32 4294967295, %s913_s18   ;;  %s913_s18 = sphi %s979_s18, %s1231_s18   ;;  %s909_s17 = sphi %s977_s17, %s1233_s17   ;;  %s905_s1 = sphi %s975_s1, %s1235_s1   ;;  %s901_s0 = sphi %s973_s0, %s1234_s0  }
   0xe   : > { %1216 = sst [smem:[#allocation23_spill]] %s909_s17  ;;  %s752_s19 = sadd.s32 4294967294, %s913_s18  }
   0xf   : > { %1217 = sst [smem:[#allocation24_spill]] %s913_s18  ;;  %s996_s20 = sadd.s32 1, %s913_s18  }
  0x10   : > { %1218 = sst [smem:[#allocation25_spill]] %s996_s20  ;;  %s130_s21 = sadd.s32 1, %s909_s17 }
  0x11   : > { %s127_s22 = ssub.s32 %s913_s18, %s996_s20  ;;  %p140_p0 = scmp.ne.s32.totalorder %s909_s17, %s905_s1 }
  0x12   : > { %p128_p1 = scmp.eq.s32.totalorder %s127_s22, 0  ;;  %p141_p2 = scmp.eq.s32.totalorder %s751_s2, 1 }
  0x13   : > { %p146_p3 = scmp.ne.s32.totalorder %s905_s1, %s901_s0  ;;  %p147_p4 = scmp.eq.s32.totalorder %s752_s19, 1 }
  0x14   : > { %s1006_s23 = scalar_select %p128_p1, %s909_s17, %s130_s21  }
  0x15   : > { %p1008_p5 = por %p141_p2, %p140_p0  ;;  %p1012_p6 = por %p147_p4, %p146_p3 }
  0x16   : > { %1219 = sst [smem:[#allocation26_spill]] %s1006_s23  ;;  %p754_p7 = scmp.ge.s32.totalorder %s913_s18, 1 }
  0x17   : > { %s1221_s25 = scalar_select %p1012_p6, 1, 0 }
  0x18   : > { %p177_p8 = scmp.lt.s32.totalorder %s913_s18, 3 }
  0x19   : > { %1222 = sst [smem:[#allocation27_spill]] %s1221_s25 }
  0x1a   : > { %p178_p9 = pnand %p754_p7, %p177_p8 }
  0x1b   : > { %s1206_s26 = sand.u32 (!%p178_p9), 1, %s905_s1   ;;  %s1019_s27 = sshll.u32 (!%p178_p9), %s751_s2, 3 }
  0x1c   : > { %181 = sbr.rel (%p178_p9) target bundleno = 415 (0x19f), region = 36  ;;  %s1023_s28 = sshll.u32 (!%p178_p9), %s1206_s26, 3 }
  0x1d   : > { %s199_s29 = sld [smem:[#allocation6 + %s1019_s27]] (!%p178_p9) }
  0x1e   : > { %s1223_s3 = sld [smem:[#allocation28_spill]] (!%p178_p9) }
  0x24   : > { %s200_s10 = scalar_lea.vmem %s1223_s3, %s199_s29 }
  0x25   : > { %v215_v0 = vld [vmem:[%s200_s10] sm:$0x1] }
  0x26   : > { %216 = vst [vmem:[#allocation2] sm:$0x1] %v215_v0 }
  0x27   : > { %234 = vsyncadd [#allocation4], 16  ;;  %s1031_s12 = sadd.s32 1, %s1019_s27 }
  0x28   : > { %s236_s13 = sld [smem:[#allocation6 + %s1031_s12]] }
  0x2e   : > { %s237_s16 = scalar_lea.vmem %s1223_s3, %s236_s13 }
  0x2f   : > { %v253_v1 = vld [vmem:[%s237_s16] sm:$0x1] }
  0x30   : > { %254 = vst [vmem:[#allocation2 + $0x1] sm:$0x1] %v253_v1 }
  0x31   : > { %272 = vsyncadd [#allocation4], 16  ;;  %s1038_s2 = sadd.s32 2, %s1019_s27 }
  0x32   : > { %s274_s19 = sld [smem:[#allocation6 + %s1038_s2]] }
  0x38   : > { %s275_s29 = scalar_lea.vmem %s1223_s3, %s274_s19 }
  0x39   : > { %v291_v2 = vld [vmem:[%s275_s29] sm:$0x1] }
  0x3a   : > { %292 = vst [vmem:[#allocation2 + $0x2] sm:$0x1] %v291_v2 }
  0x3b   : > { %310 = vsyncadd [#allocation4], 16  ;;  %s1045_s30 = sadd.s32 3, %s1019_s27 }
  0x3c   : > { %s312_s9 = sld [smem:[#allocation6 + %s1045_s30]] }
  0x42   : > { %s313_s14 = scalar_lea.vmem %s1223_s3, %s312_s9 }
  0x43   : > { %v329_v3 = vld [vmem:[%s313_s14] sm:$0x1] }
  0x44   : > { %330 = vst [vmem:[#allocation2 + $0x3] sm:$0x1] %v329_v3 }
  0x45   : > { %348 = vsyncadd [#allocation4], 16  ;;  %s1052_s15 = sadd.s32 4, %s1019_s27 }
  0x46   : > { %s350_s16 = sld [smem:[#allocation6 + %s1052_s15]] }
  0x4c   : > { %s351_s22 = scalar_lea.vmem %s1223_s3, %s350_s16 }
  0x4d   : > { %v367_v4 = vld [vmem:[%s351_s22] sm:$0x1] }
  0x4e   : > { %368 = vst [vmem:[#allocation2 + $0x4] sm:$0x1] %v367_v4 }
  0x4f   : > { %386 = vsyncadd [#allocation4], 16  ;;  %s1059_s29 = sadd.s32 5, %s1019_s27 }
  0x50   : > { %s388_s9 = sld [smem:[#allocation6 + %s1059_s29]] }
  0x56   : > { %s389_s14 = scalar_lea.vmem %s1223_s3, %s388_s9 }
  0x57   : > { %v405_v5 = vld [vmem:[%s389_s14] sm:$0x1] }
  0x58   : > { %406 = vst [vmem:[#allocation2 + $0x5] sm:$0x1] %v405_v5 }
  0x59   : > { %424 = vsyncadd [#allocation4], 16  ;;  %s1066_s26 = sadd.s32 6, %s1019_s27 }
  0x5a   : > { %s426_s16 = sld [smem:[#allocation6 + %s1066_s26]] }
  0x60   : > { %s427_s22 = scalar_lea.vmem %s1223_s3, %s426_s16 }
  0x61   : > { %v443_v6 = vld [vmem:[%s427_s22] sm:$0x1] }
  0x62   : > { %444 = vst [vmem:[#allocation2 + $0x6] sm:$0x1] %v443_v6 }
  0x63   : > { %462 = vsyncadd [#allocation4], 16  ;;  %s1073_s11 = sadd.s32 7, %s1019_s27 }
  0x64   : > { %s464_s9 = sld [smem:[#allocation6 + %s1073_s11]] }
  0x6a   : > { %s465_s14 = scalar_lea.vmem %s1223_s3, %s464_s9 }
  0x6b   : > { %v481_v7 = vld [vmem:[%s465_s14] sm:$0x1] }
  0x6c   : > { %482 = vst [vmem:[#allocation2 + $0x7] sm:$0x1] %v481_v7 }
  0x6d   : > { %500 = vsyncadd [#allocation4], 16  ;;  %s501_s16 = sld [smem:[#allocation7 + %s1019_s27]]  ;;  %vm508_vm0 = vcmask 253952  }
  0x6e   : > { %s504_s19 = sld [smem:[#allocation8 + %s1019_s27]] }
  0x6f   : > { %s510_s21 = sld [smem:[#allocation7 + %s1031_s12]] }
  0x70   : > { %s513_s22 = sld [smem:[#allocation8 + %s1031_s12]] }
  0x71   : > { %s518_s23 = sld [smem:[#allocation7 + %s1038_s2]] }
  0x72   : > { %s521_s10 = sld [smem:[#allocation8 + %s1038_s2]] }
  0x73   : > { %s502_s14 = scalar_lea.vmem %s1199_s4, %s501_s16  ;;  %s526_s3 = sld [smem:[#allocation7 + %s1045_s30]] }
  0x74   : > { %v503_v8 = vld [vmem:[%s502_s14] sm:$0x1]  ;;  %s505_s25 = scalar_lea.vmem %s1200_s5, %s504_s19  ;;  %s529_s0 = sld [smem:[#allocation8 + %s1045_s30]] }
  0x75   : > { %v506_v9 = vld [vmem:[%s505_s25] sm:$0x1]  ;;  %s511_s12 = scalar_lea.vmem %s1199_s4, %s510_s21  ;;  %s534_s2 = sld [smem:[#allocation7 + %s1052_s15]] }
  0x76   : > { %v507_v10 = vadd.f32 %v506_v9, %v503_v8  ;;  %v512_v11 = vld [vmem:[%s511_s12] sm:$0x1]  ;;  %s514_s13 = scalar_lea.vmem %s1200_s5, %s513_s22  ;;  %s537_s14 = sld [smem:[#allocation8 + %s1052_s15]] }
  0x77   : > { %v515_v12 = vld [vmem:[%s514_s13] sm:$0x1]  ;;  %s519_s25 = scalar_lea.vmem %s1199_s4, %s518_s23  ;;  %s542_s30 = sld [smem:[#allocation7 + %s1059_s29]] }
  0x78   : > { %509 = vst.msk [vmem:[#allocation3] sm:$0x1] %vm508_vm0, %v507_v10  ;;  %v516_v13 = vadd.f32 %v515_v12, %v512_v11  ;;  %v520_v14 = vld [vmem:[%s519_s25] sm:$0x1]  ;;  %s522_s19 = scalar_lea.vmem %s1200_s5, %s521_s10  ;;  %s545_s21 = sld [smem:[#allocation8 + %s1059_s29]] }
  0x79   : > { %v523_v15 = vld [vmem:[%s522_s19] sm:$0x1]  ;;  %s527_s12 = scalar_lea.vmem %s1199_s4, %s526_s3  ;;  %s550_s9 = sld [smem:[#allocation7 + %s1066_s26]] }
  0x7a   : > { %517 = vst.msk [vmem:[#allocation3 + $0x1] sm:$0x1] %vm508_vm0, %v516_v13  ;;  %v524_v16 = vadd.f32 %v523_v15, %v520_v14  ;;  %v528_v17 = vld [vmem:[%s527_s12] sm:$0x1]  ;;  %s530_s13 = scalar_lea.vmem %s1200_s5, %s529_s0  ;;  %s553_s17 = sld [smem:[#allocation8 + %s1066_s26]] }
  0x7b   : > { %v531_v18 = vld [vmem:[%s530_s13] sm:$0x1]  ;;  %s535_s29 = scalar_lea.vmem %s1199_s4, %s534_s2  ;;  %s558_s25 = sld [smem:[#allocation7 + %s1073_s11]] }
  0x7c   : > { %525 = vst.msk [vmem:[#allocation3 + $0x2] sm:$0x1] %vm508_vm0, %v524_v16  ;;  %v532_v19 = vadd.f32 %v531_v18, %v528_v17  ;;  %v536_v20 = vld [vmem:[%s535_s29] sm:$0x1]  ;;  %s538_s18 = scalar_lea.vmem %s1200_s5, %s537_s14  ;;  %s561_s19 = sld [smem:[#allocation8 + %s1073_s11]] }
  0x7d   : > { %v539_v21 = vld [vmem:[%s538_s18] sm:$0x1]  ;;  %s543_s0 = scalar_lea.vmem %s1199_s4, %s542_s30 }
  0x7e   : > { %533 = vst.msk [vmem:[#allocation3 + $0x3] sm:$0x1] %vm508_vm0, %v532_v19  ;;  %v540_v22 = vadd.f32 %v539_v21, %v536_v20  ;;  %v544_v23 = vld [vmem:[%s543_s0] sm:$0x1]  ;;  %s546_s12 = scalar_lea.vmem %s1200_s5, %s545_s21 }
  0x7f   : > { %v547_v24 = vld [vmem:[%s546_s12] sm:$0x1]  ;;  %s551_s13 = scalar_lea.vmem %s1199_s4, %s550_s9 }
  0x80   : > { %541 = vst.msk [vmem:[#allocation3 + $0x4] sm:$0x1] %vm508_vm0, %v540_v22  ;;  %v548_v25 = vadd.f32 %v547_v24, %v544_v23  ;;  %v552_v26 = vld [vmem:[%s551_s13] sm:$0x1]  ;;  %s554_s30 = scalar_lea.vmem %s1200_s5, %s553_s17 }
  0x81   : > { %v555_v27 = vld [vmem:[%s554_s30] sm:$0x1]  ;;  %s559_s29 = scalar_lea.vmem %s1199_s4, %s558_s25 }
  0x82   : > { %549 = vst.msk [vmem:[#allocation3 + $0x5] sm:$0x1] %vm508_vm0, %v548_v25  ;;  %v556_v28 = vadd.f32 %v555_v27, %v552_v26  ;;  %v560_v29 = vld [vmem:[%s559_s29] sm:$0x1]  ;;  %s562_s9 = scalar_lea.vmem %s1200_s5, %s561_s19 }
  0x83   : > { %v563_v30 = vld [vmem:[%s562_s9] sm:$0x1] }
  0x84   : > { %557 = vst.msk [vmem:[#allocation3 + $0x6] sm:$0x1] %vm508_vm0, %v556_v28  ;;  %v564_v31 = vadd.f32 %v563_v30, %v560_v29 }
  0x86   : > { %565 = vst.msk [vmem:[#allocation3 + $0x7] sm:$0x1] %vm508_vm0, %v564_v31 }
  0x87   : > { %893 = dma.done.wait [#allocation4], 128 }
  0x88   : > { %894 = vsyncadd [#allocation4], 4294967168  ;;  %v584_v33 = vld [vmem:[#allocation2] sm:$0xff]  ;;  %vm586_vm1 = vcmask 261120   ;;  %v918_v36 = vmov 32.0   ;;  %s638_s19 = scalar_lea.hbm %s1203_s8, %s1019_s27  ;;  %s1224_s0 = sld [smem:[#allocation29_spill]] }
  0x89   : > { %807 = vrcp.f32 %v918_v36  ;;  %v805_v57 = vld [vmem:[%s1201_s6] ss:$0 sm:$0xff]  ;;  %s1225_s26 = scalar_lea.vmem [#allocation9], %s1023_s28  ;;  %s642_s12 = sshll.u32 %s638_s19, 4  ;;  %s643_s12 = int_to_ptr.hbm [resolvable:$true] %s642_s12 }
  0x8a   : > { %s640_s2 = sshll.u32 %s1225_s26, 4  ;;  %s1226_s23 = smov %s1225_s26  ;;  %s641_s2 = int_to_ptr.vmem [resolvable:$true] %s640_s2 }
  0x8b   : > { %s1227_s16 = sand.u32 1, %s905_s1   ;;  %s861_s27 = sshra.s32 %s643_s12, 4  ;;  %s862_s27 = int_to_ptr.hbm [resolvable:$true] %s861_s27 }
  0x8c   : > { %s628_s13 = scalar_lea.sflag [#allocation10], %s1227_s16  ;;  %s863_s11 = scalar_lea.hbm %s862_s27, 8 }
  0x8d   : > { %v583_v32 = vld [vmem:[#allocation3] sm:$0xff]  ;;  %p864_p10 = scmp.ne.s32.totalorder %s862_s27, %s863_s11  ;;  %s867_s20 = scalar_lea.hbm %s1203_s8, 16 }
  0x8e   : > { %v585_v34 = vadd.f32 %v584_v33, %v583_v32  ;;  %v806_v60 = vld [vmem:[%s1224_s0] ss:$0 sm:$0xff]  ;;  %p868_p13 = scmp.lt.s32.totalorder %s862_s27, %s1203_s8  ;;  %p869_p0 = scmp.lt.s32.totalorder %s867_s20, %s863_s11 }
  0x8f   : > { %v808_v37 = vpop.eup %807  ;;  %p865_p11 = pnand %p864_p10, %p1008_p5 }
  0x90   : > { %v587_v35 = vsel %vm586_vm1, %v585_v34, 0.0  ;;  %v591_v38 = vmul.f32 32.0, %v808_v37  ;;  %vm595_vm2 = vweird.f32 %v808_v37  ;;  %p870_p1 = por %p869_p0, %p868_p13 }
  0x91   : > { %588 = vadd.xlane.f32.xlu0 %v587_v35  ;;  %p866_p12 = pneg %p865_p11 }
  0x92   : > { %v592_v39 = vsub.f32 1.0, %v591_v38 }
  0x93   : > { %p871_p2 = pnand %p870_p1, %p866_p12 }
  0x94   : > { %v593_v40 = vmul.f32 %v808_v37, %v592_v39 }
  0x96   : > { %v594_v41 = vadd.f32 %v808_v37, %v593_v40 }
  0x98   : > { %v596_v42 = vsel %vm595_vm2, %v808_v37, %v594_v41 }
 0x104   : > { %v589_v43 = vpop.xlane.xlu0 %588 }
 0x105   : > { %v597_v44 = vmul.f32 %v596_v42, %v589_v43 }
 0x107   : > { %v598_v45 = vsub.f32 %v585_v34, %v597_v44 }
 0x109   : > { %v599_v46 = vmul.f32 %v598_v45, %v598_v45 }
 0x10b   : > { %v600_v47 = vsel %vm586_vm1, %v599_v46, 0.0 }
 0x10c   : > { %601 = vadd.xlane.f32.xlu0 %v600_v47 }
 0x17f   : > { %v602_v48 = vpop.xlane.xlu0 %601 }
 0x180   : > { %v603_v49 = vmul.f32 %v602_v48, %v596_v42 }
 0x182   : > { %v604_v50 = vadd.f32 1e-05, %v603_v49 }
 0x184   : > { %809 = vrsqrt.f32 %v604_v50  ;;  %vm611_vm4 = vweird.f32 %v604_v50 }
 0x18a   : > { %v810_v51 = vpop.eup %809 }
 0x18b   : > { %v606_v52 = vmul.f32 %v810_v51, %v604_v50  ;;  %vm612_vm3 = vweird.f32 %v810_v51 }
 0x18c   : > { %vm613_vm5 = vmor %vm611_vm4, %vm612_vm3 }
 0x18d   : > { %v607_v53 = vmul.f32 %v810_v51, %v606_v52 }
 0x18f   : > { %v608_v54 = vmul.f32 0.5, %v607_v53 }
 0x191   : > { %v609_v55 = vsub.f32 1.5, %v608_v54 }
 0x193   : > { %v610_v56 = vmul.f32 %v810_v51, %v609_v55 }
 0x195   : > { %v614_v58 = vsel %vm613_vm5, %v810_v51, %v610_v56 }
 0x196   : > { %v615_v59 = vmul.f32 %v614_v58, %v598_v45 }
 0x198   : > { %v620_v61 = vmul.f32 %v805_v57, %v615_v59 }
 0x19a   : > { %v625_v62 = vadd.f32 %v806_v60, %v620_v61 }
 0x19c   : > { %626 = vst.msk [vmem:[%s1226_s23] sm:$0xff] %vm586_vm1, %v625_v62 }
 0x19d   : > { %874 = shalt.err (!%p871_p2)
}
 0x19e   : > { %762 = dma.vmem_to_hbm [thread:$0]  (%p1008_p5), %s641_s2, 128, %s643_s12, %s628_s13  }
 0x19f PF: > { %s1228_s28 = sld [smem:[#allocation24_spill]] }
 0x1a0   : > { %s1229_s21 = sld [smem:[#allocation22_spill]] }
 0x1a5   : > { %p768_p3 = scmp.ge.s32.totalorder %s1228_s28, 2 }
 0x1a6   : > { %s654_s9 = sand.u32 1, %s1229_s21  }
 0x1a7   : > { %p765_p4 = pnand %p768_p3, %p1012_p6  ;;  %s655_s17 = scalar_lea.sflag [#allocation10], %s654_s9 }
 0x1a9   : > { %p766_p7 = pneg %p765_p4 }
 0x1ab   : > { %896 = dma.done.wait (%p766_p7), %s655_s17, 128  }
 0x1ac   : > { %898 = vsyncadd (%p766_p7), %s655_s17, 4294967168  ;;  %s1231_s18 = sld [smem:[#allocation25_spill]]  ;;  %s1234_s0 = smov %s905_s1 }
 0x1ad   : > { %s1232_s25 = sld [smem:[#allocation23_spill]] }
 0x1ae   : > { %s1233_s17 = sld [smem:[#allocation26_spill]] }
 0x1b2   : > { %p36_p8 = scmp.ge.s32.totalorder %s1231_s18, 4  }
 0x1b3   : > { %s1235_s1 = smov %s1232_s25 }
 0x1b4   :  { %38 = sbr.rel (!%p36_p8) target bundleno = 13 (0xd), region = 371 }
 0x1b9   :  { %661 = vsyncpa [#allocation10], 1 }
 0x1ba   :  { %663 = vsyncpa [#allocation10 + $0x1], 1 }
 0x1bb   :  { %664 = vsyncmov [#allocation4] }
 0x1be   :  { %s665_s24 = vpop.sfrf %664 }
 0x1bf   :  { %p761_p5 = scmp.ne.s32.totalorder %s665_s24, 0 }
 0x1c1   :  { %669 = shalt.err (%p761_p5)  }

</bundles_post_ra>
